<compile_context>
chip_gen: v7x
topology: tpu7x:2x2x1
jax: 0.10.0
libtpu: 0.0.40
codegen_flags: <defaults>
</compile_context>

<pallas_src>
import functools

import numpy as np

import jax
import jax.numpy as jnp
from jax.experimental import pallas as pl
from jax.experimental.pallas import tpu as pltpu


def _padding(downsample, kernel_size):
    """Same formula as the PyTorch module."""
    return max(0, (kernel_size - downsample + 1) // 2)


def _whole_spec(shape):
    nd = len(shape)
    return pl.BlockSpec(tuple(shape), lambda i, _nd=nd: (0,) * _nd)


# --------------------------------- fused ResBlock1d kernel ---------------------------------

def _resblock_kernel(*refs, k, L, L1, L2, downsample, p1, p2, has_skip_conv):
    it = iter(refs)
    x_ref = next(it)            # (Cin, L)
    y_ref = next(it)            # (Cin, L)
    w1_ref = next(it)           # (k, Cout, Cin)
    w2_ref = next(it)           # (k, Cout, Cout)
    bn1s_ref = next(it)         # (Cout, 1)
    bn1b_ref = next(it)
    bn2s_ref = next(it)
    bn2b_ref = next(it)
    wskip_ref = next(it) if has_skip_conv else None     # (Cout, Cin)
    sel_ref = next(it) if downsample > 1 else None       # (L1, L2)   stride selection
    gat_ref = next(it) if downsample > 1 else None       # (ds, L, L2) maxpool gather
    x_out_ref = next(it)        # (Cout, L2)
    y_out_ref = next(it)        # (Cout, L2)
    xp_ref = next(it)           # VMEM scratch (Cin,  L + 2*p1)
    hp_ref = next(it)           # VMEM scratch (Cout, L + 2*p2)

    f32 = jnp.float32
    cin = x_ref.shape[0]
    cout = w1_ref.shape[1]

    x_n = x_ref[...].astype(f32)     # (Cin, L)
    y_n = y_ref[...].astype(f32)     # (Cin, L)

    # ---- conv1 (stride 1, "same" padding, no bias): K shifted MXU matmuls ----
    if p1 > 0:                        # only the pad columns need zeroing
        xp_ref[:, 0:p1] = jnp.zeros((cin, p1), f32)
        xp_ref[:, p1 + L:L + 2 * p1] = jnp.zeros((cin, p1), f32)
    xp_ref[:, p1:p1 + L] = x_n
    h = jnp.zeros((cout, L), f32)
    for dk in range(k):
        h = h + jnp.dot(w1_ref[dk], xp_ref[:, dk:dk + L],
                        preferred_element_type=f32)

    # ---- bn1 (eval-mode, folded affine) + ReLU; dropout1 identity ----
    h = jnp.maximum(h * bn1s_ref[...] + bn1b_ref[...], 0.0)

    # ---- conv2 (stride = downsample, no bias): stride-1 conv then exact stride select ----
    if p2 > 0:
        hp_ref[:, 0:p2] = jnp.zeros((cout, p2), f32)
        hp_ref[:, p2 + L:L + 2 * p2] = jnp.zeros((cout, p2), f32)
    hp_ref[:, p2:p2 + L] = h
    full = jnp.zeros((cout, L1), f32)
    for dk in range(k):
        full = full + jnp.dot(w2_ref[dk], hp_ref[:, dk:dk + L1],
                              preferred_element_type=f32)
    if downsample > 1:
        x2 = jnp.dot(full, sel_ref[...], preferred_element_type=f32)   # (Cout, L2)
    else:
        x2 = full

    # ---- skip connection on y: MaxPool1d(ds, ds) then 1x1 conv (both optional) ----
    if downsample > 1:
        yp = jnp.dot(y_n, gat_ref[0], preferred_element_type=f32)       # (Cin, L2)
        for m in range(1, downsample):
            yp = jnp.maximum(yp, jnp.dot(y_n, gat_ref[m],
                                         preferred_element_type=f32))
    else:
        yp = y_n
    if has_skip_conv:
        y_skip = jnp.dot(wskip_ref[...], yp, preferred_element_type=f32)  # (Cout, L2)
    else:
        y_skip = yp

    # ---- residual add; y output is the pre-bn2 stream ----
    x2 = x2 + y_skip
    y_out_ref[...] = x2.astype(y_out_ref.dtype)

    # ---- bn2 (folded) + ReLU; dropout2 identity ----
    x_out_ref[...] = jnp.maximum(x2 * bn2s_ref[...] + bn2b_ref[...], 0.0
                                 ).astype(x_out_ref.dtype)


def resblock1d_forward(x, y, params, *, kernel_size, downsample):
    n, cin, L = x.shape
    k = kernel_size
    w1t = params["conv1_w_t"]                   # (k, Cout, Cin)
    w2t = params["conv2_w_t"]                   # (k, Cout, Cout)
    cout = w1t.shape[1]

    p1 = _padding(1, k)
    p2 = _padding(downsample, k)
    L1 = L + 2 * p2 - k + 1                     # stride-1 conv2 length
    L2 = (L + 2 * p2 - k) // downsample + 1     # conv2 output length
    has_skip_conv = cin != cout

    inputs = [x, y, w1t, w2t,
              params["bn1_scale"], params["bn1_bias"],
              params["bn2_scale"], params["bn2_bias"]]
    in_specs = [
        pl.BlockSpec((None, cin, L), lambda i: (i, 0, 0)),
        pl.BlockSpec((None, cin, L), lambda i: (i, 0, 0)),
        _whole_spec(w1t.shape),
        _whole_spec(w2t.shape),
        _whole_spec((cout, 1)), _whole_spec((cout, 1)),
        _whole_spec((cout, 1)), _whole_spec((cout, 1)),
    ]
    if has_skip_conv:
        inputs.append(params["skip_w"])
        in_specs.append(_whole_spec(params["skip_w"].shape))
    if downsample > 1:
        pool_len = (L - downsample) // downsample + 1
        assert pool_len == L2 and downsample * L2 <= L, "skip/main lengths must match"
        # Shape-only 0/1 matrices, built once on the host (trace-time constants).
        cols = np.arange(L2)
        sel = np.zeros((L1, L2), np.float32)
        sel[downsample * cols, cols] = 1.0
        gat = np.zeros((downsample, L, L2), np.float32)
        for m in range(downsample):
            gat[m, downsample * cols + m, cols] = 1.0
        inputs.append(jnp.asarray(sel))
        in_specs.append(_whole_spec(sel.shape))
        inputs.append(jnp.asarray(gat))
        in_specs.append(_whole_spec(gat.shape))

    kernel = functools.partial(
        _resblock_kernel, k=k, L=L, L1=L1, L2=L2,
        downsample=downsample, p1=p1, p2=p2, has_skip_conv=has_skip_conv)

    out_shape = (jax.ShapeDtypeStruct((n, cout, L2), jnp.float32),
                 jax.ShapeDtypeStruct((n, cout, L2), jnp.float32))
    out_specs = (pl.BlockSpec((None, cout, L2), lambda i: (i, 0, 0)),
                 pl.BlockSpec((None, cout, L2), lambda i: (i, 0, 0)))

    return pl.pallas_call(
        kernel,
        out_shape=out_shape,
        grid=(n,),
        in_specs=in_specs,
        out_specs=out_specs,
        scratch_shapes=[
            pltpu.VMEM((cin, L + 2 * p1), jnp.float32),
            pltpu.VMEM((cout, L + 2 * p2), jnp.float32),
        ],
        compiler_params=pltpu.CompilerParams(dimension_semantics=("parallel",)),
    )(*inputs)


# ------------------------------------- params & reference -------------------------------------

def init_raw_params(key, cin, cout, k):
    """PyTorch-layout parameters (conv weights (O,I,K), BN running stats)."""
    ks = jax.random.split(key, 12)

    def u(kk, shape, fan_in):
        b = 1.0 / (fan_in ** 0.5)
        return jax.random.uniform(kk, shape, jnp.float32, -b, b)

    raw = {
        "conv1_w": u(ks[0], (cout, cin, k), cin * k),
        "conv2_w": u(ks[1], (cout, cout, k), cout * k),
        "bn1_gamma": jax.random.uniform(ks[2], (cout,), jnp.float32, 0.5, 1.5),
        "bn1_beta": 0.1 * jax.random.normal(ks[3], (cout,), jnp.float32),
        "bn1_mean": 0.1 * jax.random.normal(ks[4], (cout,), jnp.float32),
        "bn1_var": jax.random.uniform(ks[5], (cout,), jnp.float32, 0.5, 1.5),
        "bn2_gamma": jax.random.uniform(ks[6], (cout,), jnp.float32, 0.5, 1.5),
        "bn2_beta": 0.1 * jax.random.normal(ks[7], (cout,), jnp.float32),
        "bn2_mean": 0.1 * jax.random.normal(ks[8], (cout,), jnp.float32),
        "bn2_var": jax.random.uniform(ks[9], (cout,), jnp.float32, 0.5, 1.5),
    }
    if cin != cout:
        raw["skip_w"] = u(ks[10], (cout, cin, 1), cin)
    return raw


def prepare_params(raw, eps=1e-5):
    """One-time (outside jit) kernel-ready preprocessing: transpose weights, fold BN."""
    cout = raw["conv1_w"].shape[0]
    s1 = raw["bn1_gamma"] / jnp.sqrt(raw["bn1_var"] + eps)
    b1 = raw["bn1_beta"] - raw["bn1_mean"] * s1
    s2 = raw["bn2_gamma"] / jnp.sqrt(raw["bn2_var"] + eps)
    b2 = raw["bn2_beta"] - raw["bn2_mean"] * s2
    p = {
        "conv1_w_t": jnp.transpose(raw["conv1_w"], (2, 0, 1)),   # (k, Cout, Cin)
        "conv2_w_t": jnp.transpose(raw["conv2_w"], (2, 0, 1)),   # (k, Cout, Cout)
        "bn1_scale": s1.reshape(cout, 1), "bn1_bias": b1.reshape(cout, 1),
        "bn2_scale": s2.reshape(cout, 1), "bn2_bias": b2.reshape(cout, 1),
    }
    if "skip_w" in raw:
        p["skip_w"] = raw["skip_w"][:, :, 0]                     # (Cout, Cin)
    return p


def resblock1d_reference(x, y, raw, *, downsample, eps=1e-5):
    """Pure-JAX/XLA reference with identical (eval-mode) semantics."""
    cout, cin, k = raw["conv1_w"].shape
    p1 = _padding(1, k)
    p2 = _padding(downsample, k)

    def conv1d(v, w, stride, pad):
        return jax.lax.conv_general_dilated(
            v, w, window_strides=(stride,), padding=[(pad, pad)],
            dimension_numbers=("NCH", "OIH", "NCH"))

    def bn(v, g, b, m, var):
        s = g / jnp.sqrt(var + eps)
        return (v - m[None, :, None]) * s[None, :, None] + b[None, :, None]

    ys = y
    if downsample > 1:
        ys = jax.lax.reduce_window(ys, -jnp.inf, jax.lax.max,
                                   (1, 1, downsample), (1, 1, downsample), "VALID")
    if "skip_w" in raw:
        ys = conv1d(ys, raw["skip_w"], 1, 0)

    h = conv1d(x, raw["conv1_w"], 1, p1)
    h = jnp.maximum(bn(h, raw["bn1_gamma"], raw["bn1_beta"],
                       raw["bn1_mean"], raw["bn1_var"]), 0.0)
    h2 = conv1d(h, raw["conv2_w"], downsample, p2)
    h2 = h2 + ys
    y_out = h2
    x_out = jnp.maximum(bn(h2, raw["bn2_gamma"], raw["bn2_beta"],
                           raw["bn2_mean"], raw["bn2_var"]), 0.0)
    return x_out, y_out


# --------------------------------------------- main ---------------------------------------------

if __name__ == "__main__":
    key = jax.random.PRNGKey(0)
    kx, ky, kp = jax.random.split(key, 3)

    # ResBlock1d(n_filters_in=4, n_filters_out=8, downsample=2, kernel_size=3, dropout_rate=0.3)
    B, C_IN, C_OUT, L = 2, 4, 8, 16
    K, DOWNSAMPLE = 3, 2

    x = jax.random.normal(kx, (B, C_IN, L), jnp.float32)
    y = jax.random.normal(ky, (B, C_IN, L), jnp.float32)

    raw = init_raw_params(kp, C_IN, C_OUT, K)
    params = prepare_params(raw)   # weight transpose + BN fold once, outside jit

    fwd = jax.jit(functools.partial(resblock1d_forward,
                                    kernel_size=K, downsample=DOWNSAMPLE))
    x_out, y_out = fwd(x, y, params)
    x_out, y_out = jax.block_until_ready((x_out, y_out))

    L2 = (L + 2 * _padding(DOWNSAMPLE, K) - K) // DOWNSAMPLE + 1
    assert x_out.shape == (B, C_OUT, L2), x_out.shape
    assert y_out.shape == (B, C_OUT, L2), y_out.shape
    assert x_out.dtype == jnp.float32 and y_out.dtype == jnp.float32

    xr, yr = resblock1d_reference(x, y, raw, downsample=DOWNSAMPLE)
    assert float(jnp.max(jnp.abs(x_out - xr))) < 1e-2
    assert float(jnp.max(jnp.abs(y_out - yr))) < 1e-2

    print("KERNEL_OK")
</pallas_src>

<mosaic_0001>
module attributes {stable_mosaic.version = 11 : i64} {
  func.func @_resblock_kernel(%arg0: i32, %arg1: memref<1x4x16xf32, #tpu.memory_space<vmem>>, %arg2: memref<1x4x16xf32, #tpu.memory_space<vmem>>, %arg3: memref<3x8x4xf32, #tpu.memory_space<vmem>>, %arg4: memref<3x8x8xf32, #tpu.memory_space<vmem>>, %arg5: memref<8x1xf32, #tpu.memory_space<vmem>>, %arg6: memref<8x1xf32, #tpu.memory_space<vmem>>, %arg7: memref<8x1xf32, #tpu.memory_space<vmem>>, %arg8: memref<8x1xf32, #tpu.memory_space<vmem>>, %arg9: memref<8x4xf32, #tpu.memory_space<vmem>>, %arg10: memref<16x8xf32, #tpu.memory_space<vmem>>, %arg11: memref<2x16x8xf32, #tpu.memory_space<vmem>>, %arg12: memref<1x8x8xf32, #tpu.memory_space<vmem>>, %arg13: memref<1x8x8xf32, #tpu.memory_space<vmem>>, %arg14: memref<4x18xf32, #tpu.memory_space<vmem>>, %arg15: memref<8x18xf32, #tpu.memory_space<vmem>>) attributes {dimension_semantics = [#tpu.dimension_semantics<parallel>], iteration_bounds = array<i64: 2>, scalar_prefetch = 0 : i64, scratch_operands = 2 : i64, tpu.core_type = #tpu.core_type<tc>, window_params = [{transform_indices = @transform_0, window_bounds = array<i64: 1, 4, 16>}, {transform_indices = @transform_1, window_bounds = array<i64: 1, 4, 16>}, {pipeline_mode = #tpu.pipeline_mode<synchronous>, transform_indices = @transform_2, window_bounds = array<i64: 3, 8, 4>}, {pipeline_mode = #tpu.pipeline_mode<synchronous>, transform_indices = @transform_3, window_bounds = array<i64: 3, 8, 8>}, {pipeline_mode = #tpu.pipeline_mode<synchronous>, transform_indices = @transform_4, window_bounds = array<i64: 8, 1>}, {pipeline_mode = #tpu.pipeline_mode<synchronous>, transform_indices = @transform_5, window_bounds = array<i64: 8, 1>}, {pipeline_mode = #tpu.pipeline_mode<synchronous>, transform_indices = @transform_6, window_bounds = array<i64: 8, 1>}, {pipeline_mode = #tpu.pipeline_mode<synchronous>, transform_indices = @transform_7, window_bounds = array<i64: 8, 1>}, {pipeline_mode = #tpu.pipeline_mode<synchronous>, transform_indices = @transform_8, window_bounds = array<i64: 8, 4>}, {pipeline_mode = #tpu.pipeline_mode<synchronous>, transform_indices = @transform_9, window_bounds = array<i64: 16, 8>}, {pipeline_mode = #tpu.pipeline_mode<synchronous>, transform_indices = @transform_10, window_bounds = array<i64: 2, 16, 8>}, {transform_indices = @transform_11, window_bounds = array<i64: 1, 8, 8>}, {transform_indices = @transform_12, window_bounds = array<i64: 1, 8, 8>}]} {
    %c0 = arith.constant 0 : index
    %c0_0 = arith.constant 0 : index
    %c0_1 = arith.constant 0 : index
    %0 = vector.load %arg1[%c0, %c0_0, %c0_1] : memref<1x4x16xf32, #tpu.memory_space<vmem>>, vector<1x4x16xf32>
    %1 = vector.shape_cast %0 : vector<1x4x16xf32> to vector<4x16xf32>
    %c0_2 = arith.constant 0 : index
    %c0_3 = arith.constant 0 : index
    %c0_4 = arith.constant 0 : index
    %2 = vector.load %arg2[%c0_2, %c0_3, %c0_4] : memref<1x4x16xf32, #tpu.memory_space<vmem>>, vector<1x4x16xf32>
    %3 = vector.shape_cast %2 : vector<1x4x16xf32> to vector<4x16xf32>
    %cst = arith.constant 0.000000e+00 : f32
    %4 = vector.broadcast %cst : f32 to vector<4x1xf32>
    %c0_5 = arith.constant 0 : index
    %c0_6 = arith.constant 0 : index
    %5 = vector.load %arg14[%c0_5, %c0_6] : memref<4x18xf32, #tpu.memory_space<vmem>>, vector<4x1xf32>
    tpu.vector_store %arg14[%c0_5, %c0_6], %4 {strides = array<i32>} : memref<4x18xf32, #tpu.memory_space<vmem>>, vector<4x1xf32>,
    %cst_7 = arith.constant 0.000000e+00 : f32
    %6 = vector.broadcast %cst_7 : f32 to vector<4x1xf32>
    %c0_8 = arith.constant 0 : index
    %c17 = arith.constant 17 : index
    %7 = vector.load %arg14[%c0_8, %c17] : memref<4x18xf32, #tpu.memory_space<vmem>>, vector<4x1xf32>
    tpu.vector_store %arg14[%c0_8, %c17], %6 {strides = array<i32>} : memref<4x18xf32, #tpu.memory_space<vmem>>, vector<4x1xf32>,
    %c0_9 = arith.constant 0 : index
    %c1 = arith.constant 1 : index
    %8 = vector.load %arg14[%c0_9, %c1] : memref<4x18xf32, #tpu.memory_space<vmem>>, vector<4x16xf32>
    tpu.vector_store %arg14[%c0_9, %c1], %1 {strides = array<i32>} : memref<4x18xf32, #tpu.memory_space<vmem>>, vector<4x16xf32>,
    %cst_10 = arith.constant 0.000000e+00 : f32
    %9 = vector.broadcast %cst_10 : f32 to vector<8x16xf32>
    %c0_11 = arith.constant 0 : index
    %c0_12 = arith.constant 0 : index
    %c0_13 = arith.constant 0 : index
    %10 = vector.load %arg3[%c0_11, %c0_12, %c0_13] : memref<3x8x4xf32, #tpu.memory_space<vmem>>, vector<1x8x4xf32>
    %11 = vector.shape_cast %10 : vector<1x8x4xf32> to vector<8x4xf32>
    %c0_14 = arith.constant 0 : index
    %c0_15 = arith.constant 0 : index
    %12 = vector.load %arg14[%c0_14, %c0_15] : memref<4x18xf32, #tpu.memory_space<vmem>>, vector<4x16xf32>
    %cst_16 = arith.constant dense<0.000000e+00> : vector<8x16xf32>
    %13 = tpu.matmul %11, %12, %cst_16 {dimension_numbers = #tpu.dot_dimension_numbers<[1], [0], [0], [1], [0, 0, 1, 1], [], []>} : vector<8x4xf32>, vector<4x16xf32>, vector<8x16xf32> -> vector<8x16xf32>
    %14 = arith.addf %9, %13 : vector<8x16xf32>
    %c1_17 = arith.constant 1 : index
    %c0_18 = arith.constant 0 : index
    %c0_19 = arith.constant 0 : index
    %15 = vector.load %arg3[%c1_17, %c0_18, %c0_19] : memref<3x8x4xf32, #tpu.memory_space<vmem>>, vector<1x8x4xf32>
    %16 = vector.shape_cast %15 : vector<1x8x4xf32> to vector<8x4xf32>
    %c0_20 = arith.constant 0 : index
    %c1_21 = arith.constant 1 : index
    %17 = vector.load %arg14[%c0_20, %c1_21] : memref<4x18xf32, #tpu.memory_space<vmem>>, vector<4x16xf32>
    %cst_22 = arith.constant dense<0.000000e+00> : vector<8x16xf32>
    %18 = tpu.matmul %16, %17, %cst_22 {dimension_numbers = #tpu.dot_dimension_numbers<[1], [0], [0], [1], [0, 0, 1, 1], [], []>} : vector<8x4xf32>, vector<4x16xf32>, vector<8x16xf32> -> vector<8x16xf32>
    %19 = arith.addf %14, %18 : vector<8x16xf32>
    %c2 = arith.constant 2 : index
    %c0_23 = arith.constant 0 : index
    %c0_24 = arith.constant 0 : index
    %20 = vector.load %arg3[%c2, %c0_23, %c0_24] : memref<3x8x4xf32, #tpu.memory_space<vmem>>, vector<1x8x4xf32>
    %21 = vector.shape_cast %20 : vector<1x8x4xf32> to vector<8x4xf32>
    %c0_25 = arith.constant 0 : index
    %c2_26 = arith.constant 2 : index
    %22 = vector.load %arg14[%c0_25, %c2_26] : memref<4x18xf32, #tpu.memory_space<vmem>>, vector<4x16xf32>
    %cst_27 = arith.constant dense<0.000000e+00> : vector<8x16xf32>
    %23 = tpu.matmul %21, %22, %cst_27 {dimension_numbers = #tpu.dot_dimension_numbers<[1], [0], [0], [1], [0, 0, 1, 1], [], []>} : vector<8x4xf32>, vector<4x16xf32>, vector<8x16xf32> -> vector<8x16xf32>
    %24 = arith.addf %19, %23 : vector<8x16xf32>
    %c0_28 = arith.constant 0 : index
    %c0_29 = arith.constant 0 : index
    %25 = vector.load %arg5[%c0_28, %c0_29] : memref<8x1xf32, #tpu.memory_space<vmem>>, vector<8x1xf32>
    %26 = vector.broadcast %25 : vector<8x1xf32> to vector<8x16xf32>
    %27 = arith.mulf %24, %26 : vector<8x16xf32>
    %c0_30 = arith.constant 0 : index
    %c0_31 = arith.constant 0 : index
    %28 = vector.load %arg6[%c0_30, %c0_31] : memref<8x1xf32, #tpu.memory_space<vmem>>, vector<8x1xf32>
    %29 = vector.broadcast %28 : vector<8x1xf32> to vector<8x16xf32>
    %30 = arith.addf %27, %29 : vector<8x16xf32>
    %cst_32 = arith.constant 0.000000e+00 : f32
    %31 = vector.broadcast %cst_32 : f32 to vector<8x16xf32>
    %32 = arith.maximumf %30, %31 : vector<8x16xf32>
    %cst_33 = arith.constant 0.000000e+00 : f32
    %33 = vector.broadcast %cst_33 : f32 to vector<8x1xf32>
    %c0_34 = arith.constant 0 : index
    %c0_35 = arith.constant 0 : index
    %34 = vector.load %arg15[%c0_34, %c0_35] : memref<8x18xf32, #tpu.memory_space<vmem>>, vector<8x1xf32>
    tpu.vector_store %arg15[%c0_34, %c0_35], %33 {strides = array<i32>} : memref<8x18xf32, #tpu.memory_space<vmem>>, vector<8x1xf32>,
    %cst_36 = arith.constant 0.000000e+00 : f32
    %35 = vector.broadcast %cst_36 : f32 to vector<8x1xf32>
    %c0_37 = arith.constant 0 : index
    %c17_38 = arith.constant 17 : index
    %36 = vector.load %arg15[%c0_37, %c17_38] : memref<8x18xf32, #tpu.memory_space<vmem>>, vector<8x1xf32>
    tpu.vector_store %arg15[%c0_37, %c17_38], %35 {strides = array<i32>} : memref<8x18xf32, #tpu.memory_space<vmem>>, vector<8x1xf32>,
    %c0_39 = arith.constant 0 : index
    %c1_40 = arith.constant 1 : index
    %37 = vector.load %arg15[%c0_39, %c1_40] : memref<8x18xf32, #tpu.memory_space<vmem>>, vector<8x16xf32>
    tpu.vector_store %arg15[%c0_39, %c1_40], %32 {strides = array<i32>} : memref<8x18xf32, #tpu.memory_space<vmem>>, vector<8x16xf32>,
    %cst_41 = arith.constant 0.000000e+00 : f32
    %38 = vector.broadcast %cst_41 : f32 to vector<8x16xf32>
    %c0_42 = arith.constant 0 : index
    %c0_43 = arith.constant 0 : index
    %c0_44 = arith.constant 0 : index
    %39 = vector.load %arg4[%c0_42, %c0_43, %c0_44] : memref<3x8x8xf32, #tpu.memory_space<vmem>>, vector<1x8x8xf32>
    %40 = vector.shape_cast %39 : vector<1x8x8xf32> to vector<8x8xf32>
    %c0_45 = arith.constant 0 : index
    %c0_46 = arith.constant 0 : index
    %41 = vector.load %arg15[%c0_45, %c0_46] : memref<8x18xf32, #tpu.memory_space<vmem>>, vector<8x16xf32>
    %cst_47 = arith.constant dense<0.000000e+00> : vector<8x16xf32>
    %42 = tpu.matmul %40, %41, %cst_47 {dimension_numbers = #tpu.dot_dimension_numbers<[1], [0], [0], [1], [0, 0, 1, 1], [], []>} : vector<8x8xf32>, vector<8x16xf32>, vector<8x16xf32> -> vector<8x16xf32>
    %43 = arith.addf %38, %42 : vector<8x16xf32>
    %c1_48 = arith.constant 1 : index
    %c0_49 = arith.constant 0 : index
    %c0_50 = arith.constant 0 : index
    %44 = vector.load %arg4[%c1_48, %c0_49, %c0_50] : memref<3x8x8xf32, #tpu.memory_space<vmem>>, vector<1x8x8xf32>
    %45 = vector.shape_cast %44 : vector<1x8x8xf32> to vector<8x8xf32>
    %c0_51 = arith.constant 0 : index
    %c1_52 = arith.constant 1 : index
    %46 = vector.load %arg15[%c0_51, %c1_52] : memref<8x18xf32, #tpu.memory_space<vmem>>, vector<8x16xf32>
    %cst_53 = arith.constant dense<0.000000e+00> : vector<8x16xf32>
    %47 = tpu.matmul %45, %46, %cst_53 {dimension_numbers = #tpu.dot_dimension_numbers<[1], [0], [0], [1], [0, 0, 1, 1], [], []>} : vector<8x8xf32>, vector<8x16xf32>, vector<8x16xf32> -> vector<8x16xf32>
    %48 = arith.addf %43, %47 : vector<8x16xf32>
    %c2_54 = arith.constant 2 : index
    %c0_55 = arith.constant 0 : index
    %c0_56 = arith.constant 0 : index
    %49 = vector.load %arg4[%c2_54, %c0_55, %c0_56] : memref<3x8x8xf32, #tpu.memory_space<vmem>>, vector<1x8x8xf32>
    %50 = vector.shape_cast %49 : vector<1x8x8xf32> to vector<8x8xf32>
    %c0_57 = arith.constant 0 : index
    %c2_58 = arith.constant 2 : index
    %51 = vector.load %arg15[%c0_57, %c2_58] : memref<8x18xf32, #tpu.memory_space<vmem>>, vector<8x16xf32>
    %cst_59 = arith.constant dense<0.000000e+00> : vector<8x16xf32>
    %52 = tpu.matmul %50, %51, %cst_59 {dimension_numbers = #tpu.dot_dimension_numbers<[1], [0], [0], [1], [0, 0, 1, 1], [], []>} : vector<8x8xf32>, vector<8x16xf32>, vector<8x16xf32> -> vector<8x16xf32>
    %53 = arith.addf %48, %52 : vector<8x16xf32>
    %c0_60 = arith.constant 0 : index
    %c0_61 = arith.constant 0 : index
    %54 = vector.load %arg10[%c0_60, %c0_61] : memref<16x8xf32, #tpu.memory_space<vmem>>, vector<16x8xf32>
    %cst_62 = arith.constant dense<0.000000e+00> : vector<8x8xf32>
    %55 = tpu.matmul %53, %54, %cst_62 {dimension_numbers = #tpu.dot_dimension_numbers<[1], [0], [0], [1], [0, 0, 1, 1], [], []>} : vector<8x16xf32>, vector<16x8xf32>, vector<8x8xf32> -> vector<8x8xf32>
    %c0_63 = arith.constant 0 : index
    %c0_64 = arith.constant 0 : index
    %c0_65 = arith.constant 0 : index
    %56 = vector.load %arg11[%c0_63, %c0_64, %c0_65] : memref<2x16x8xf32, #tpu.memory_space<vmem>>, vector<1x16x8xf32>
    %57 = vector.shape_cast %56 : vector<1x16x8xf32> to vector<16x8xf32>
    %cst_66 = arith.constant dense<0.000000e+00> : vector<4x8xf32>
    %58 = tpu.matmul %3, %57, %cst_66 {dimension_numbers = #tpu.dot_dimension_numbers<[1], [0], [0], [1], [0, 0, 1, 1], [], []>} : vector<4x16xf32>, vector<16x8xf32>, vector<4x8xf32> -> vector<4x8xf32>
    %c1_67 = arith.constant 1 : index
    %c0_68 = arith.constant 0 : index
    %c0_69 = arith.constant 0 : index
    %59 = vector.load %arg11[%c1_67, %c0_68, %c0_69] : memref<2x16x8xf32, #tpu.memory_space<vmem>>, vector<1x16x8xf32>
    %60 = vector.shape_cast %59 : vector<1x16x8xf32> to vector<16x8xf32>
    %cst_70 = arith.constant dense<0.000000e+00> : vector<4x8xf32>
    %61 = tpu.matmul %3, %60, %cst_70 {dimension_numbers = #tpu.dot_dimension_numbers<[1], [0], [0], [1], [0, 0, 1, 1], [], []>} : vector<4x16xf32>, vector<16x8xf32>, vector<4x8xf32> -> vector<4x8xf32>
    %62 = arith.maximumf %58, %61 : vector<4x8xf32>
    %c0_71 = arith.constant 0 : index
    %c0_72 = arith.constant 0 : index
    %63 = vector.load %arg9[%c0_71, %c0_72] : memref<8x4xf32, #tpu.memory_space<vmem>>, vector<8x4xf32>
    %cst_73 = arith.constant dense<0.000000e+00> : vector<8x8xf32>
    %64 = tpu.matmul %63, %62, %cst_73 {dimension_numbers = #tpu.dot_dimension_numbers<[1], [0], [0], [1], [0, 0, 1, 1], [], []>} : vector<8x4xf32>, vector<4x8xf32>, vector<8x8xf32> -> vector<8x8xf32>
    %65 = arith.addf %55, %64 : vector<8x8xf32>
    %c0_74 = arith.constant 0 : index
    %c0_75 = arith.constant 0 : index
    %c0_76 = arith.constant 0 : index
    %66 = vector.load %arg13[%c0_74, %c0_75, %c0_76] : memref<1x8x8xf32, #tpu.memory_space<vmem>>, vector<1x8x8xf32>
    %67 = vector.shape_cast %66 : vector<1x8x8xf32> to vector<8x8xf32>
    %68 = vector.shape_cast %65 : vector<8x8xf32> to vector<1x8x8xf32>
    tpu.vector_store %arg13[%c0_74, %c0_75, %c0_76], %68 {strides = array<i32>} : memref<1x8x8xf32, #tpu.memory_space<vmem>>, vector<1x8x8xf32>,
    %c0_77 = arith.constant 0 : index
    %c0_78 = arith.constant 0 : index
    %69 = vector.load %arg7[%c0_77, %c0_78] : memref<8x1xf32, #tpu.memory_space<vmem>>, vector<8x1xf32>
    %70 = vector.broadcast %69 : vector<8x1xf32> to vector<8x8xf32>
    %71 = arith.mulf %65, %70 : vector<8x8xf32>
    %c0_79 = arith.constant 0 : index
    %c0_80 = arith.constant 0 : index
    %72 = vector.load %arg8[%c0_79, %c0_80] : memref<8x1xf32, #tpu.memory_space<vmem>>, vector<8x1xf32>
    %73 = vector.broadcast %72 : vector<8x1xf32> to vector<8x8xf32>
    %74 = arith.addf %71, %73 : vector<8x8xf32>
    %cst_81 = arith.constant 0.000000e+00 : f32
    %75 = vector.broadcast %cst_81 : f32 to vector<8x8xf32>
    %76 = arith.maximumf %74, %75 : vector<8x8xf32>
    %c0_82 = arith.constant 0 : index
    %c0_83 = arith.constant 0 : index
    %c0_84 = arith.constant 0 : index
    %77 = vector.load %arg12[%c0_82, %c0_83, %c0_84] : memref<1x8x8xf32, #tpu.memory_space<vmem>>, vector<1x8x8xf32>
    %78 = vector.shape_cast %77 : vector<1x8x8xf32> to vector<8x8xf32>
    %79 = vector.shape_cast %76 : vector<8x8xf32> to vector<1x8x8xf32>
    tpu.vector_store %arg12[%c0_82, %c0_83, %c0_84], %79 {strides = array<i32>} : memref<1x8x8xf32, #tpu.memory_space<vmem>>, vector<1x8x8xf32>,
    return
  }
  func.func @transform_0(%arg0: i32) -> (i32, i32, i32) {
    %c0_i32 = arith.constant 0 : i32
    %c0_i32_0 = arith.constant 0 : i32
    %c0_i32_1 = arith.constant 0 : i32
    return %arg0, %c0_i32, %c0_i32_0 : i32, i32, i32
  }
  func.func @transform_1(%arg0: i32) -> (i32, i32, i32) {
    %c0_i32 = arith.constant 0 : i32
    %c0_i32_0 = arith.constant 0 : i32
    %c0_i32_1 = arith.constant 0 : i32
    return %arg0, %c0_i32, %c0_i32_0 : i32, i32, i32
  }
  func.func @transform_2(%arg0: i32) -> (i32, i32, i32) {
    %c0_i32 = arith.constant 0 : i32
    %c0_i32_0 = arith.constant 0 : i32
    %c0_i32_1 = arith.constant 0 : i32
    %c0_i32_2 = arith.constant 0 : i32
    return %c0_i32, %c0_i32_0, %c0_i32_1 : i32, i32, i32
  }
  func.func @transform_3(%arg0: i32) -> (i32, i32, i32) {
    %c0_i32 = arith.constant 0 : i32
    %c0_i32_0 = arith.constant 0 : i32
    %c0_i32_1 = arith.constant 0 : i32
    %c0_i32_2 = arith.constant 0 : i32
    return %c0_i32, %c0_i32_0, %c0_i32_1 : i32, i32, i32
  }
  func.func @transform_4(%arg0: i32) -> (i32, i32) {
    %c0_i32 = arith.constant 0 : i32
    %c0_i32_0 = arith.constant 0 : i32
    %c0_i32_1 = arith.constant 0 : i32
    return %c0_i32, %c0_i32_0 : i32, i32
  }
  func.func @transform_5(%arg0: i32) -> (i32, i32) {
    %c0_i32 = arith.constant 0 : i32
    %c0_i32_0 = arith.constant 0 : i32
    %c0_i32_1 = arith.constant 0 : i32
    return %c0_i32, %c0_i32_0 : i32, i32
  }
  func.func @transform_6(%arg0: i32) -> (i32, i32) {
    %c0_i32 = arith.constant 0 : i32
    %c0_i32_0 = arith.constant 0 : i32
    %c0_i32_1 = arith.constant 0 : i32
    return %c0_i32, %c0_i32_0 : i32, i32
  }
  func.func @transform_7(%arg0: i32) -> (i32, i32) {
    %c0_i32 = arith.constant 0 : i32
    %c0_i32_0 = arith.constant 0 : i32
    %c0_i32_1 = arith.constant 0 : i32
    return %c0_i32, %c0_i32_0 : i32, i32
  }
  func.func @transform_8(%arg0: i32) -> (i32, i32) {
    %c0_i32 = arith.constant 0 : i32
    %c0_i32_0 = arith.constant 0 : i32
    %c0_i32_1 = arith.constant 0 : i32
    return %c0_i32, %c0_i32_0 : i32, i32
  }
  func.func @transform_9(%arg0: i32) -> (i32, i32) {
    %c0_i32 = arith.constant 0 : i32
    %c0_i32_0 = arith.constant 0 : i32
    %c0_i32_1 = arith.constant 0 : i32
    return %c0_i32, %c0_i32_0 : i32, i32
  }
  func.func @transform_10(%arg0: i32) -> (i32, i32, i32) {
    %c0_i32 = arith.constant 0 : i32
    %c0_i32_0 = arith.constant 0 : i32
    %c0_i32_1 = arith.constant 0 : i32
    %c0_i32_2 = arith.constant 0 : i32
    return %c0_i32, %c0_i32_0, %c0_i32_1 : i32, i32, i32
  }
  func.func @transform_11(%arg0: i32) -> (i32, i32, i32) {
    %c0_i32 = arith.constant 0 : i32
    %c0_i32_0 = arith.constant 0 : i32
    %c0_i32_1 = arith.constant 0 : i32
    return %arg0, %c0_i32, %c0_i32_0 : i32, i32, i32
  }
  func.func @transform_12(%arg0: i32) -> (i32, i32, i32) {
    %c0_i32 = arith.constant 0 : i32
    %c0_i32_0 = arith.constant 0 : i32
    %c0_i32_1 = arith.constant 0 : i32
    return %arg0, %c0_i32, %c0_i32_0 : i32, i32, i32
  }
}

</mosaic_0001>

<bundles_post_ra>
// kernel: resblock1d_forward.1
= control target key start
LH: loop header
LB: loop body
LE: loop exit
PB: predicated region body
PF: predicated region fallthrough
CT: control target
= control target key end

     0   :  { %s2259_s0 = inlined_call_operand.hbm [shape: f32[2,4,16], index: 0, kind: input, shape index: {}]   ;;  %s2260_s1 = inlined_call_operand.hbm [shape: f32[2,4,16], index: 1, kind: input, shape index: {}]   ;;  %s2261_s2 = inlined_call_operand.vmem [shape: f32[3,8,4], index: 2, kind: input, shape index: {}]   ;;  %s2262_s3 = inlined_call_operand.vmem [shape: f32[3,8,8], index: 3, kind: input, shape index: {}]   ;;  %s2263_s4 = inlined_call_operand.vmem [shape: f32[8,1], index: 4, kind: input, shape index: {}]   ;;  %s2264_s5 = inlined_call_operand.vmem [shape: f32[8,1], index: 5, kind: input, shape index: {}]   ;;  %s2265_s6 = inlined_call_operand.vmem [shape: f32[8,1], index: 6, kind: input, shape index: {}]   ;;  %s2266_s7 = inlined_call_operand.vmem [shape: f32[8,1], index: 7, kind: input, shape index: {}]   ;;  %s2267_s8 = inlined_call_operand.vmem [shape: f32[8,4], index: 8, kind: input, shape index: {}]   ;;  %s2268_s9 = inlined_call_operand.vmem [shape: f32[16,8], index: 9, kind: input, shape index: {}]   ;;  %s2269_s10 = inlined_call_operand.vmem [shape: f32[2,16,8], index: 10, kind: input, shape index: {}]   ;;  %s2270_s11 = inlined_call_operand.hbm [shape: f32[2,8,8], index: 11, kind: output, shape index: {0}]   ;;  %s2271_s12 = inlined_call_operand.hbm [shape: f32[2,8,8], index: 12, kind: output, shape index: {1}]  }
   0x1   :  { %2281 = sst [smem:[#allocation21_spill]] %s2259_s0 }
   0x2   :  { %18 = vsyncpa [#allocation5], 0 }
   0x3   :  { %20 = vsyncpa [#allocation5 + $0x1], 0 }
   0x4   :  { %21 = vsyncpa [#allocation8], 0 }
   0x5   :  { %23 = vsyncpa [#allocation8 + $0x1], 0 }
   0x6   :  { %24 = vsyncpa [#allocation6], 0 }
   0x7   :  { %26 = vsyncpa [#allocation6 + $0x1], 0 }
   0x8   :  { %27 = vsyncpa [#allocation11], 0 }
   0x9   :  { %29 = vsyncpa [#allocation11 + $0x1], 0  ;;  %s1903_s21 = smov 0   ;;  %s1905_s22 = smov 0  }
   0xa   :  { %s1907_s23 = smov 0   ;;  %s1909_s24 = smov 0  }
   0xb LB: > { %2282 = sst [smem:[#allocation16_spill]] %s1821_s23  ;;  %s1924_s25 = sadd.s32 4294967295, %s1825_s24   ;;  %s1825_s24 = sphi %s1909_s24, %s2305_s24   ;;  %s1821_s23 = sphi %s1907_s23, %s2307_s23   ;;  %s1817_s22 = sphi %s1905_s22, %s2309_s22   ;;  %s1813_s21 = sphi %s1903_s21, %s2308_s21  }
   0xc   : > { %2283 = sst [smem:[#allocation17_spill]] %s1825_s24  ;;  %s1463_s26 = sadd.s32 4294967294, %s1825_s24  }
   0xd   : > { %s1928_s27 = sadd.s32 1, %s1825_s24   ;;  %s42_s28 = sadd.s32 1, %s1821_s23 }
   0xe   : > { %2284 = sst [smem:[#allocation18_spill]] %s1928_s27  ;;  %s39_s29 = ssub.s32 %s1825_s24, %s1928_s27 }
   0xf   : > { %p49_p0 = scmp.ne.s32.totalorder %s1821_s23, %s1817_s22  ;;  %p40_p1 = scmp.eq.s32.totalorder %s39_s29, 0 }
  0x10   : > { %p50_p2 = scmp.eq.s32.totalorder %s1825_s24, 0  ;;  %p55_p3 = scmp.ne.s32.totalorder %s1817_s22, %s1813_s21 }
  0x11   : > { %p56_p4 = scmp.eq.s32.totalorder %s1924_s25, 0  ;;  %p294_p7 = scmp.eq.s32.totalorder %s1924_s25, 1 }
  0x12   : > { %s1940_s30 = scalar_select %p40_p1, %s1821_s23, %s42_s28  }
  0x13   : > { %p1942_p5 = por %p50_p2, %p49_p0  ;;  %p1946_p6 = por %p56_p4, %p55_p3 }
  0x14   : > { %2285 = sst [smem:[#allocation19_spill]] %s1940_s30  ;;  %p300_p8 = scmp.eq.s32.totalorder %s1463_s26, 1 }
  0x15   : > { %s2287_s14 = scalar_select %p1946_p6, 1, 0 }
  0x16   : > { %p1620_p10 = scmp.lt.s32.totalorder %s1825_s24, 2  ;;  %p1953_p11 = por %p294_p7, %p49_p0 }
  0x17   : > { %p1957_p12 = por %p300_p8, %p55_p3  ;;  %s1962_s17 = sand.u32 1, %s1821_s23  }
  0x18   : > { %s2288_s15 = scalar_select %p1953_p11, 1, 0 }
  0x19   : > { %s2289_s16 = scalar_select %p1957_p12, 1, 0 }
  0x1a   : > { %s2274_s18 = sshll.u32 %s1825_s24, 6  ;;  %s2273_s19 = sshll.u32 %s1962_s17, 2 }
  0x1b   : > { %2290 = sst [smem:[#allocation20_spill]] %s2289_s16  ;;  %s2291_s0 = sld [smem:[#allocation21_spill]] }
  0x1c   : > { %s377_s29 = scalar_lea.vmem [#allocation4], %s2273_s19  ;;  %p1977_p13 = pnand %p1620_p10, %p1942_p5 }
  0x1d   : > { %s384_s30 = sshll.u32 %s377_s29, 4  ;;  %s374_s20 = scalar_lea.sflag [#allocation5], %s1962_s17  ;;  %s1981_s30 = int_to_ptr.vmem [resolvable:$true] %s384_s30 }
  0x1e   : > { %p1665_p3 = pneg %p1977_p13 }
  0x21   : > { %s1971_s28 = scalar_lea.hbm %s2291_s0, %s2274_s18  ;;  %s1668_s19 = scalar_lea.hbm %s2291_s0, 128 }
  0x22   : > { %s1663_s26 = scalar_lea.hbm %s1971_s28, 64  ;;  %p1669_p5 = scmp.lt.u32.totalorder %s1971_s28, %s2291_s0 }
  0x23   : > { %p1664_p2 = scmp.ne.s32.totalorder %s1971_s28, %s1663_s26  ;;  %p1670_p8 = scmp.lt.u32.totalorder %s1668_s19, %s1663_s26 }
  0x24   : > { %p1672_p9 = scmp.lt.u32.totalorder %s1663_s26, %s1971_s28 }
  0x25   : > { %p1666_p4 = pnand %p1665_p3, %p1664_p2  ;;  %p1671_p10 = por %p1670_p8, %p1669_p5 }
  0x27   : > { %p1667_p7 = pneg %p1666_p4  ;;  %p1673_p0 = por %p1672_p9, %p1671_p10 }
  0x29   : > { %p1674_p1 = pnand %p1673_p0, %p1667_p7 }
  0x2b   : > { %1677 = shalt.err (!%p1674_p1)
}
  0x2c   : > { %s1678_s16 = scalar_lea.vmem %s1981_s30, 64  ;;  %s1827_s13 = smov [#allocation4]  }
  0x2d   : > { %p1679_p2 = scmp.ne.s32.totalorder %s1981_s30, %s1678_s16  ;;  %s1683_s29 = sshll.u32 %s1827_s13, 4  ;;  %s1684_s29 = int_to_ptr.vmem [resolvable:$false] %s1683_s29 }
  0x2e   : > { %s1685_s27 = scalar_lea.vmem %s1684_s29, 128  ;;  %p1686_p11 = scmp.lt.s32.totalorder %s1981_s30, %s1684_s29 }
  0x2f   : > { %p1681_p4 = pnand %p1679_p2, %p1665_p3  ;;  %p1687_p5 = scmp.lt.s32.totalorder %s1685_s27, %s1678_s16 }
  0x31   : > { %p1682_p12 = pneg %p1681_p4  ;;  %p1688_p8 = por %p1687_p5, %p1686_p11 }
  0x33   : > { %p1689_p9 = pnand %p1688_p8, %p1682_p12 }
  0x35   : > { %1692 = shalt.err (!%p1689_p9)
}
  0x36   : > { %1609 = dma.hbm_to_vmem [thread:$0]  (!%p1977_p13), %s1971_s28, 64, %s1981_s30, %s374_s20  }
  0x37   : > { %p2293_p0 = scmp.lt.s32.totalorder %s1825_s24, 3  ;;  %p2294_p1 = scmp.ge.s32.totalorder %s1825_s24, 1 }
  0x38   : > { %s2296_s16 = sshll.u32 %s1825_s24, 6  ;;  %s2297_s29 = sshll.u32 %s1962_s17, 2 }
  0x39   : > { %p2015_p7 = pnand %p2294_p1, %p2293_p0  ;;  %s2024_s13 = scalar_lea.hbm %s2260_s1, %s2296_s16 }
  0x3a   : > { %s395_s27 = scalar_lea.vmem [#allocation7], %s2297_s29  ;;  %s392_s30 = scalar_lea.sflag [#allocation8], %s1962_s17 }
  0x3b   : > { %s2295_s18 = scalar_select %p2015_p7, 1, 0 }
  0x3c   : > { %s402_s0 = sshll.u32 %s395_s27, 4  ;;  %s1693_s28 = scalar_lea.hbm %s2024_s13, 64  ;;  %s403_s0 = int_to_ptr.vmem [resolvable:$true] %s402_s0 }
  0x3d   : > { %p1694_p11 = scmp.ne.s32.totalorder %s2024_s13, %s1693_s28  ;;  %s1698_s16 = scalar_lea.hbm %s2260_s1, 128 }
  0x3e   : > { %p1699_p2 = scmp.lt.u32.totalorder %s2024_s13, %s2260_s1  ;;  %p1700_p4 = scmp.lt.u32.totalorder %s1698_s16, %s1693_s28 }
  0x3f   : > { %p1696_p12 = pnand %p1694_p11, %p1665_p3  ;;  %p1702_p8 = scmp.lt.u32.totalorder %s1693_s28, %s2024_s13 }
  0x40   : > { %p1701_p5 = por %p1700_p4, %p1699_p2 }
  0x41   : > { %p1697_p10 = pneg %p1696_p12 }
  0x42   : > { %p1703_p9 = por %p1702_p8, %p1701_p5 }
  0x44   : > { %p1704_p0 = pnand %p1703_p9, %p1697_p10 }
  0x46   : > { %1707 = shalt.err (!%p1704_p0)
}
  0x47   : > { %s1708_s17 = scalar_lea.vmem %s403_s0, 64  ;;  %s1828_s29 = smov [#allocation7]  }
  0x48   : > { %p1709_p1 = scmp.ne.s32.totalorder %s403_s0, %s1708_s17  ;;  %s1713_s24 = sshll.u32 %s1828_s29, 4  ;;  %s1714_s24 = int_to_ptr.vmem [resolvable:$false] %s1713_s24 }
  0x49   : > { %s1715_s27 = scalar_lea.vmem %s1714_s24, 128  ;;  %p1716_p6 = scmp.lt.s32.totalorder %s403_s0, %s1714_s24 }
  0x4a   : > { %p1711_p11 = pnand %p1709_p1, %p1665_p3  ;;  %p1717_p7 = scmp.lt.s32.totalorder %s1715_s27, %s1708_s17 }
  0x4c   : > { %p1712_p12 = pneg %p1711_p11  ;;  %p1718_p2 = por %p1717_p7, %p1716_p6 }
  0x4e   : > { %p1719_p4 = pnand %p1718_p2, %p1712_p12 }
  0x50   : > { %1722 = shalt.err (!%p1719_p4)
}
  0x51   : > { %1612 = dma.hbm_to_vmem [thread:$0]  (!%p1977_p13), %s2024_s13, 64, %s403_s0, %s392_s30  }
  0x52   : > { %p2298_p10 = scmp.ne.s32.totalorder %s2295_s18, 0 }
  0x53   : > { %s2051_s28 = sand.u32 (!%p2298_p10), 1, %s1817_s22   ;;  %p2299_p3 = scmp.ne.s32.totalorder (!%p2298_p10), %s2287_s14, 0 }
  0x54   : > { %411 = sbr.rel (%p2298_p10) target bundleno = 1287 (0x507), region = 64  ;;  %s1471_s20 = sshll.u32 (!%p2298_p10), %s2051_s28, 2 }
  0x55   : > { %s414_s16 = scalar_lea.sflag (!%p2298_p10), [#allocation5], %s2051_s28  ;;  %s417_s19 = scalar_lea.vmem (!%p2298_p10), [#allocation4], %s1471_s20 }
  0x5b   : > { %1796 = dma.done.wait (%p2299_p3), %s414_s16, 64  }
  0x5c   : > { %1798 = vsyncadd (%p2299_p3), %s414_s16, 4294967232  ;;  %s423_s0 = scalar_lea.sflag [#allocation8], %s2051_s28  ;;  %s2060_s23 = scalar_lea.vmem [#allocation7], %s1471_s20 }
  0x5d   : > { %1800 = dma.done.wait (%p2299_p3), %s423_s0, 64  }
  0x5e   : > { %1802 = vsyncadd (%p2299_p3), %s423_s0, 4294967232  ;;  %vm479_vm0 = vcmask 3072   ;;  %vm481_vm1 = vcmask 142472   ;;  %v1829_v0 = vmov 0.0   ;;  %vm1830_vm2 = vmmov 0   ;;  %s1831_s14 = smov 1  }
  0x5f   : > { %480 = vst.msk [vmem:[#allocation2] sm:$0xf] %vm479_vm0, %v1829_v0  ;;  %1529 = vmatprep.subr.mxu0 %v1829_v0  ;;  %1524 = vmatprep.subr.mxu1 %v1829_v0  ;;  %v477_v1 = vld [vmem:[%s417_s19] sm:$0xf]  ;;  %vm487_vm3 = vcmask 134152   ;;  %v1832_v2 = vmov 0  }
  0x60   : > { %482 = vst.msk [vmem:[#allocation2] sm:$0xf] %vm481_vm1, %v1829_v0  ;;  %1531 = vmatprep.mubr.msk.f32.mxu0 %vm1830_vm2, %v1829_v0  ;;  %1526 = vmatprep.mubr.msk.f32.mxu1 %vm1830_vm2, %v1829_v0  ;;  %vm500_vm4 = vcmask 1043456   ;;  %v489_v5 = vld [vmem:[%s2261_s2] sm:$0xff]  ;;  %vm496_vm5 = vcmask 31744   ;;  %s1833_s30 = smov 126  }
  0x61   : > { %484 = vrot.lane.b32.xlu0 %v477_v1, %s1831_s14  ;;  %1661 = vset.pattern.permute.xlu1 %v1832_v2  ;;  %s1834_s26 = smov 127   ;;  %v728_v6 = vld [vmem:[%s2263_s4] sm:$0xff]  ;;  %v1475_v8 = vld [vmem:[%s2261_s2 + $0x8] sm:$0xff]  ;;  %v1480_v9 = vld [vmem:[%s2261_s2 + $0x10] sm:$0xff]  ;;  %vm743_vm6 = vcmask 7168   ;;  %vm745_vm7 = vcmask 146568  }
  0x62   : > { %1662 = vset.pattern.permute.xlu0 %v1832_v2  ;;  %v735_v7 = vld [vmem:[%s2264_s5] sm:$0xff]  ;;  %744 = vst.msk [vmem:[#allocation3] sm:$0xff] %vm743_vm6, %v1829_v0  ;;  %vm751_vm8 = vcmask 138248   ;;  %v990_v27 = vld [vmem:[%s2269_s10 + $0x8] sm:$0xff]  ;;  %v1835_v29 = vmov 0.0|0.0   ;;  %vm991_vm9 = vcmask 130048  }
  0x63   : > { %746 = vst.msk [vmem:[#allocation3] sm:$0xff] %vm745_vm7, %v1829_v0  ;;  %v1297_v24 = vld [vmem:[%s2266_s7] sm:$0xff]  ;;  %v478_v30 = vld [vmem:[%s2060_s23] sm:$0xf]  ;;  %v1483_v31 = vld [vmem:[%s2262_s3 + $0x8] sm:$0xff]  ;;  %vm761_vm10 = vcmask 64512  }
  0x64   : > { %v1290_v25 = vld [vmem:[%s2265_s6] sm:$0xff]  ;;  %v1489_v35 = vld [vmem:[%s2269_s10 + $0x10] sm:$0xff]  ;;  %v1490_v36 = vld [vmem:[%s2269_s10 + $0x18] sm:$0xff]  ;;  %s1473_s23 = sshll.u32 %s2051_s28, 3  ;;  %s1497_s16 = sshll.u32 %s1924_s25, 7 }
  0x65   : > { %v989_v26 = vld [vmem:[%s2269_s10] sm:$0xff]  ;;  %v1486_v37 = vld [vmem:[%s2262_s3 + $0x10] sm:$0xff]  ;;  %v1584_v38 = vpack.c.bf16 %v1490_v36, %v1489_v35  ;;  %v988_v44 = vld [vmem:[%s2268_s9 + $0x8] sm:$0xff]  ;;  %s476_s19 = scalar_lea.vmem [#allocation10], %s1473_s23  ;;  %s2176_s17 = scalar_lea.hbm %s2271_s12, %s1497_s16 }
  0x66   : > { %v1581_v28 = vpack.c.bf16 %v990_v27, %v989_v26  ;;  %v753_v33 = vld [vmem:[%s2262_s3] sm:$0xff]  ;;  %s1338_s0 = sshll.u32 %s476_s19, 4  ;;  %s2181_s29 = scalar_lea.vmem [#allocation9], %s1473_s23  ;;  %s2178_s0 = int_to_ptr.vmem [resolvable:$true] %s1338_s0 }
  0x67   : > { %v987_v43 = vld [vmem:[%s2268_s9] sm:$0xff]  ;;  %s1325_s24 = sshll.u32 %s2181_s29, 4  ;;  %s1312_s27 = scalar_lea.sflag [#allocation11], %s2051_s28  ;;  %s2215_s24 = int_to_ptr.vmem [resolvable:$true] %s1325_s24 }
  0x68   : > { %v1139_v48 = vld [vmem:[%s2267_s8] sm:$0xff]  ;;  %v1587_v49 = vpack.c.bf16 %v988_v44, %v987_v43  ;;  %p2300_p13 = scmp.ne.s32.totalorder %s2288_s15, 0  ;;  %s1836_s20 = smov [#allocation10]  }
  0xd3   : > { %v485_v3 = vpop.permute.xlu0 %484 }
  0xd4   : > { %488 = vst.msk [vmem:[#allocation2] sm:$0xf] %vm487_vm3, %v485_v3 }
  0xdb   : > { %v490_v4 = vld [vmem:[#allocation2] sm:$0xf] }
  0xdc   : > { %650 = vrot.lane.b32.xlu1 %v490_v4, %s1833_s30  ;;  %494 = vrot.lane.b32.xlu0 %v490_v4, %s1834_s26 }
  0xdd   : > { %1530 = vmatpush3.msk.msra.mxu0 %vm500_vm4, %v490_v4 }
  0xde   : > { %1532 = vmatmul.mubr.msk.f32.vlgmr.msra.gmra.mrb[0].mxu0 %vm496_vm5, %v489_v5  ;;  %1534 = vmatprep.subr.mxu0 %v1829_v0 }
  0xdf   : > { %1536 = vmatprep.mubr.msk.f32.mxu0 %vm1830_vm2, %v1829_v0 }
  0xe0   : > { %731 = vperm.xlu1 %1661, %v728_v6   ;;  %738 = vperm.xlu0 %1662, %v735_v7  }
 0x14e   : > { %v651_v10 = vpop.permute.xlu1 %650  ;;  %v495_v11 = vpop.permute.xlu0 %494 }
 0x14f   : > { %1525 = vmatpush3.msk.msra.mxu1 %vm500_vm4, %v495_v11  ;;  %1535 = vmatpush3.msk.msra.mxu0 %vm500_vm4, %v651_v10 }
 0x150   : > { %1527 = vmatmul.mubr.msk.f32.vlgmr.msra.gmra.mrb[0].mxu1 %vm496_vm5, %v1475_v8  ;;  %1537 = vmatmul.mubr.msk.f32.vlgmr.msra.gmra.mrb[0].mxu0 %vm496_vm5, %v1480_v9 }
 0x151   : > { %1539 = vmatprep.subr.mxu1 %v1829_v0  ;;  %1541 = vmatprep.mubr.msk.f32.mxu1 %vm1830_vm2, %v1829_v0 }
 0x152   : > { %1558 = vmatprep.mubr.msk.f32.mxu0 %vm1830_vm2, %v1829_v0  ;;  %1580 = vmatprep.subr.bf16.mxu0 %v1835_v29 }
 0x153   : > { %1582 = vmatpush3.bf16.msra.mxu0 %v1581_v28 }
 0x154   : > { %1568 = vmatprep.subr.mxu0 %v1829_v0 }
 0x156   : > { %1559 = vmatmul.mubr.msk.f32.vlgmr.msra.gmra.mrb[2].mxu0 %vm991_vm9, %v478_v30 }
 0x157   : > { %1570 = vmatprep.mubr.msk.f32.mxu0 %vm1830_vm2, %v1829_v0 }
 0x15f   : > { %v732_v12 = vpop.permute.xlu1 %731  ;;  %v739_v18 = vpop.permute.xlu0 %738 }
 0x223   : > { %v569_v13 = vpop.f32.mrb[0].mxu1  ;;  %v723_v14 = vpop.f32.mrb[0].mxu0 }
 0x224   : > { %v1589_v15 = vadd.f32 %v723_v14, %v569_v13  ;;  %v1538_v16 = vpop.f32.mrb[1].mxu0  ;;  %v1528_v17 = vpop.f32.mrb[1].mxu1 }
 0x226   : > { %v734_v19 = vmul.f32 %v1589_v15, %v732_v12 }
 0x228   : > { %v741_v20 = vadd.f32 %v739_v18, %v734_v19 }
 0x229   : > { %v1061_v39 = vpop.f32.mrb[2].mxu0 }
 0x22a   : > { %v742_v21 = vmax.f32 %v741_v20, 0.0  ;;  %v1560_v40 = vpop.f32.mrb[3].mxu0 }
 0x22c   : > { %748 = vrot.lane.b32.xlu1 %v742_v21, %s1831_s14  ;;  %s1723_s14 = scalar_lea.vmem %s2178_s0, 128 }
 0x22d   : > { %p1724_p6 = scmp.ne.s32.totalorder %s2178_s0, %s1723_s14 }
 0x22f   : > { %p1725_p7 = pnand %p1724_p6, %p2300_p13 }
 0x231   : > { %p1726_p5 = pneg %p1725_p7 }
 0x29e   : > { %v749_v22 = vpop.permute.xlu1 %748 }
 0x29f   : > { %752 = vst.msk [vmem:[#allocation3] sm:$0xff] %vm751_vm8, %v749_v22 }
 0x2a6   : > { %v754_v23 = vld [vmem:[#allocation3] sm:$0xff] }
 0x2a7   : > { %910 = vrot.lane.b32.xlu0 %v754_v23, %s1833_s30  ;;  %758 = vrot.lane.b32.xlu1 %v754_v23, %s1834_s26  ;;  %s1727_s30 = sshll.u32 %s1836_s20, 4  ;;  %s1728_s30 = int_to_ptr.vmem [resolvable:$false] %s1727_s30 }
 0x2a8   : > { %s1729_s26 = scalar_lea.vmem %s1728_s30, 256  ;;  %p1730_p8 = scmp.lt.s32.totalorder %s2178_s0, %s1728_s30 }
 0x2a9   : > { %p1731_p9 = scmp.lt.s32.totalorder %s1729_s26, %s1723_s14 }
 0x2ab   : > { %1300 = vperm.xlu0 %1662, %v1297_v24   ;;  %1293 = vperm.xlu1 %1661, %v1290_v25   ;;  %p1732_p0 = por %p1731_p9, %p1730_p8 }
 0x2ad   : > { %p1733_p1 = pnand %p1732_p0, %p1726_p5 }
 0x319   : > { %v759_v32 = vpop.permute.xlu1 %758  ;;  %v911_v34 = vpop.permute.xlu0 %910 }
 0x31a   : > { %1540 = vmatpush3.msra.mxu1 %v759_v32 }
 0x31b   : > { %1542 = vmatmul.mubr.msk.f32.vlgmr.msra.gmra.mrb[2].mxu1 %vm761_vm10, %v1483_v31  ;;  %1544 = vmatprep.subr.mxu1 %v1829_v0 }
 0x31c   : > { %1545 = vmatpush3.msra.mxu1 %v754_v23  ;;  %1546 = vmatprep.mubr.msk.f32.mxu1 %vm1830_vm2, %v1829_v0 }
 0x31d   : > { %1549 = vmatprep.subr.mxu1 %v1829_v0 }
 0x323   : > { %1547 = vmatmul.mubr.msk.f32.vlgmr.msra.gmra.mrb[2].mxu1 %vm761_vm10, %v753_v33 }
 0x324   : > { %1550 = vmatpush3.msra.mxu1 %v911_v34  ;;  %1551 = vmatprep.mubr.msk.f32.mxu1 %vm1830_vm2, %v1829_v0 }
 0x325   : > { %1583 = vmatprep.subr.bf16.mxu1 %v1835_v29 }
 0x32a   : > { %v1294_v50 = vpop.permute.xlu1 %1293  ;;  %v1301_v54 = vpop.permute.xlu0 %1300 }
 0x32b   : > { %1552 = vmatmul.mubr.msk.f32.vlgmr.msra.gmra.mrb[2].mxu1 %vm761_vm10, %v1486_v37 }
 0x32c   : > { %1585 = vmatpush3.bf16.msra.mxu1 %v1584_v38  ;;  %1565 = vmatprep.mubr.msk.f32.mxu1 %vm1830_vm2, %v1829_v0 }
 0x32f   : > { %1566 = vmatmul.mubr.msk.f32.vlgmr.msra.gmra.mrb[4].mxu1 %vm991_vm9, %v478_v30 }
 0x3fe   : > { %v982_v41 = vpop.f32.mrb[2].mxu1 }
 0x3ff   : > { %v1553_v42 = vpop.f32.mrb[3].mxu1 }
 0x402   : > { %v1134_v45 = vpop.f32.mrb[4].mxu1 }
 0x403   : > { %v1138_v46 = vmax.f32 %v1061_v39, %v1134_v45  ;;  %v1567_v47 = vpop.f32.mrb[5].mxu1 }
 0x405   : > { %1569 = vmatpush3.msk.msra.mxu0 %vm500_vm4, %v1138_v46 }
 0x406   : > { %1571 = vmatmul.mubr.msk.f32.vlgmr.msra.gmra.mrb[4].mxu0 %vm496_vm5, %v1139_v48  ;;  %1586 = vmatprep.subr.bf16.mxu0 %v1835_v29 }
 0x407   : > { %1588 = vmatpush3.bf16.msra.mxu0 %v1587_v49  ;;  %1577 = vmatprep.mubr.msk.f32.mxu0 %vm1830_vm2, %v1829_v0 }
 0x40e   : > { %1578 = vmatmul.mubr.msk.f32.vlgmr.msra.gmra.mrb[4].mxu0 %vm991_vm9, %v982_v41 }
 0x4e1   : > { %v1285_v51 = vpop.f32.mrb[4].mxu0 }
 0x4e2   : > { %1289 = vst.msk [vmem:[%s476_s19] sm:$0xff] %vm761_vm10, %v1285_v51  ;;  %v1296_v52 = vmul.f32 %v1294_v50, %v1285_v51  ;;  %v1579_v53 = vpop.f32.mrb[5].mxu0 }
 0x4e3   : > { %1736 = shalt.err (!%p1733_p1)
}
 0x4e4   : > { %s1737_s23 = scalar_lea.hbm %s2176_s17, 128  ;;  %s1741_s13 = scalar_lea.hbm %s2271_s12, 256 }
 0x4e5   : > { %p1738_p11 = scmp.ne.s32.totalorder %s2176_s17, %s1737_s23  ;;  %p1742_p4 = scmp.lt.u32.totalorder %s2176_s17, %s2271_s12 }
 0x4e6   : > { %p1743_p10 = scmp.lt.u32.totalorder %s1741_s13, %s1737_s23  ;;  %p1745_p6 = scmp.lt.u32.totalorder %s1737_s23, %s2176_s17 }
 0x4e7   : > { %p1739_p12 = pnand %p1738_p11, %p2300_p13 }
 0x4e8   : > { %p1744_p3 = por %p1743_p10, %p1742_p4 }
 0x4e9   : > { %p1740_p2 = pneg %p1739_p12 }
 0x4ea   : > { %p1746_p7 = por %p1745_p6, %p1744_p3 }
 0x4ec   : > { %p1747_p5 = pnand %p1746_p7, %p1740_p2 }
 0x4ee   : > { %1750 = shalt.err (!%p1747_p5)
}
 0x4ef   : > { %1603 = dma.vmem_to_hbm [thread:$0]  (%p2300_p13), %s2178_s0, 128, %s2176_s17, %s1312_s27   ;;  %v1303_v55 = vadd.f32 %v1301_v54, %v1296_v52 }
 0x4f0   : > { %s2211_s23 = scalar_lea.hbm %s2270_s11, %s1497_s16  ;;  %s1307_s19 = scalar_lea.sflag [#allocation6], %s2051_s28 }
 0x4f1   : > { %v1304_v56 = vmax.f32 %v1303_v55, 0.0  ;;  %s1751_s18 = scalar_lea.vmem %s2215_s24, 128  ;;  %s1837_s25 = smov [#allocation9]  }
 0x4f2   : > { %p1752_p8 = scmp.ne.s32.totalorder %s2215_s24, %s1751_s18  ;;  %s1755_s0 = sshll.u32 %s1837_s25, 4  ;;  %s1756_s0 = int_to_ptr.vmem [resolvable:$false] %s1755_s0 }
 0x4f3   : > { %1305 = vst.msk [vmem:[%s2181_s29] sm:$0xff] %vm761_vm10, %v1304_v56  ;;  %s1757_s17 = scalar_lea.vmem %s1756_s0, 256  ;;  %p1758_p1 = scmp.lt.s32.totalorder %s2215_s24, %s1756_s0 }
 0x4f4   : > { %p1753_p9 = pnand %p1752_p8, %p2300_p13  ;;  %p1759_p11 = scmp.lt.s32.totalorder %s1757_s17, %s1751_s18 }
 0x4f6   : > { %p1754_p0 = pneg %p1753_p9  ;;  %p1760_p12 = por %p1759_p11, %p1758_p1 }
 0x4f8   : > { %p1761_p2 = pnand %p1760_p12, %p1754_p0 }
 0x4fa   : > { %1764 = shalt.err (!%p1761_p2)
}
 0x4fb   : > { %s1765_s28 = scalar_lea.hbm %s2211_s23, 128  ;;  %s1769_s27 = scalar_lea.hbm %s2270_s11, 256 }
 0x4fc   : > { %p1766_p4 = scmp.ne.s32.totalorder %s2211_s23, %s1765_s28  ;;  %p1770_p6 = scmp.lt.u32.totalorder %s2211_s23, %s2270_s11 }
 0x4fd   : > { %p1771_p7 = scmp.lt.u32.totalorder %s1769_s27, %s1765_s28  ;;  %p1773_p8 = scmp.lt.u32.totalorder %s1765_s28, %s2211_s23 }
 0x4fe   : > { %p1767_p10 = pnand %p1766_p4, %p2300_p13 }
 0x4ff   : > { %p1772_p5 = por %p1771_p7, %p1770_p6 }
 0x500   : > { %p1768_p3 = pneg %p1767_p10 }
 0x501   : > { %p1774_p9 = por %p1773_p8, %p1772_p5 }
 0x503   : > { %p1775_p0 = pnand %p1774_p9, %p1768_p3 }
 0x505   : > { %1778 = shalt.err (!%p1775_p0)
}
 0x506   : > { %1602 = dma.vmem_to_hbm [thread:$0]  (%p2300_p13), %s2215_s24, 128, %s2211_s23, %s1307_s19  }
 0x507 PF: > { %s2301_s30 = sld [smem:[#allocation20_spill]]  ;;  %s2302_s14 = sld [smem:[#allocation17_spill]] }
 0x508   : > { %s1350_s26 = sand.u32 1, %s1813_s21  }
 0x509   : > { %s1351_s18 = scalar_lea.sflag [#allocation6], %s1350_s26 }
 0x50d   : > { %p2303_p1 = scmp.ne.s32.totalorder %s2301_s30, 0  ;;  %p2304_p11 = scmp.ge.s32.totalorder %s2302_s14, 2 }
 0x50f   : > { %p1614_p12 = pnand %p2304_p11, %p2303_p1 }
 0x511   : > { %1804 = dma.done.wait (!%p1614_p12), %s1351_s18, 128  }
 0x512   : > { %1806 = vsyncadd (!%p1614_p12), %s1351_s18, 4294967168  ;;  %s1360_s25 = scalar_lea.sflag [#allocation11], %s1350_s26 }
 0x513   : > { %1808 = dma.done.wait (!%p1614_p12), %s1360_s25, 128  }
 0x514   : > { %1810 = vsyncadd (!%p1614_p12), %s1360_s25, 4294967168  ;;  %s2305_s24 = sld [smem:[#allocation18_spill]]  ;;  %s2306_s15 = sld [smem:[#allocation16_spill]] }
 0x515   : > { %s2307_s23 = sld [smem:[#allocation19_spill]]  ;;  %s2308_s21 = smov %s1817_s22 }
 0x51a   : > { %p32_p13 = scmp.ge.s32.totalorder %s2305_s24, 4   ;;  %s2309_s22 = smov %s2306_s15 }
 0x51c   :  { %34 = sbr.rel (!%p32_p13) target bundleno = 11 (0xb), region = 144 }
 0x523   :  { %1365 = vsyncpa [#allocation5], 1 }
 0x524   :  { %1367 = vsyncpa [#allocation5 + $0x1], 1 }
 0x525   :  { %1368 = vsyncpa [#allocation8], 1 }
 0x526   :  { %1370 = vsyncpa [#allocation8 + $0x1], 1 }
 0x527   :  { %1371 = vsyncpa [#allocation6], 1 }
 0x528   :  { %1373 = vsyncpa [#allocation6 + $0x1], 1 }
 0x529   :  { %1374 = vsyncpa [#allocation11], 1 }
 0x52a   :  { %1376 = vsyncpa [#allocation11 + $0x1], 1 }

</bundles_post_ra>
